<compile_context>
chip_gen: v5e
topology: v5e:2x2
jax: 0.10.0
libtpu: 0.0.40
codegen_flags: <defaults>
</compile_context>

<pallas_src>
import jax
import jax.numpy as jnp
from jax.experimental import pallas as pl
from jax.experimental.pallas import tpu as pltpu

GROUPS = 4  # Conv2d_light hardcodes groups=4


def _round_up(x, m):
    return (x + m - 1) // m * m


def _conv_bn_relu_kernel(p_ref, w_ref, b_ref, o_ref):
    # p_ref: (TM, Kc)        im2col patch rows (bf16)
    # w_ref: (Kc, Cout_pad)  per-group weights with BN-eval scale pre-folded (bf16)
    # b_ref: (1, Cout_pad)   folded conv-bias + BN shift (f32)
    # o_ref: (TM, Cout_pad)
    acc = jnp.dot(p_ref[...], w_ref[...], preferred_element_type=jnp.float32)
    o_ref[...] = jnp.maximum(acc + b_ref[...], 0.0).astype(o_ref.dtype)


def conv2d_light_forward(x, weight, bias, gamma, beta, running_mean, running_var,
                         *, stride=1, same_padding=False, eps=1e-5,
                         tile_m=512, compute_dtype=jnp.bfloat16):
    N, Cin, H, W = x.shape
    Cout, Cin_g, K, _ = weight.shape
    G = GROUPS
    assert Cin % G == 0 and Cout % G == 0 and Cin_g == Cin // G
    Cout_g = Cout // G

    pad = (K - 1) // 2 if same_padding else 0  # same formula as the PyTorch module
    if pad:
        x = jnp.pad(x, ((0, 0), (0, 0), (pad, pad), (pad, pad)))
    Hp, Wp = H + 2 * pad, W + 2 * pad
    Ho = (Hp - K) // stride + 1
    Wo = (Wp - K) // stride + 1

    # ---- layout glue (plain JAX): grouped im2col built directly in final layout
    # xg: (G, N, Hp, Wp, Cin_g) -- only the 1x-sized activation gets transposed.
    xg = x.reshape(N, G, Cin_g, Hp, Wp).transpose(1, 0, 3, 4, 2)
    taps = []
    for ky in range(K):
        for kx in range(K):
            taps.append(xg[:, :,
                           ky: ky + (Ho - 1) * stride + 1: stride,
                           kx: kx + (Wo - 1) * stride + 1: stride, :])
    # (G, N, Ho, Wo, Cin_g, K*K): feature order (cin_g, ky, kx) matches weight flatten.
    p = jnp.stack(taps, axis=-1)
    M = N * Ho * Wo
    Kc = Cin_g * K * K
    p = p.reshape(G, M, Kc)

    # ---- tiling / padding choices -------------------------------------------
    TM = min(tile_m, _round_up(M, 16))          # bounded VMEM, multiple of 16
    M_pad = _round_up(M, TM)
    Cout_pad = _round_up(Cout_g, 128)           # lane-dense output stores

    if M_pad != M:
        p = jnp.pad(p, ((0, 0), (0, M_pad - M), (0, 0)))
    p = p.astype(compute_dtype)

    # weights: (Cout, Cin_g, K, K) -> (G, Kc, Cout_g), fold BN-eval scale in.
    eff_scale = gamma / jnp.sqrt(running_var + eps)            # (Cout,)
    eff_shift = beta + (bias - running_mean) * eff_scale       # (Cout,)
    wmat = weight.reshape(G, Cout_g, Kc).transpose(0, 2, 1)    # (G, Kc, Cout_g)
    wmat = wmat * eff_scale.reshape(G, 1, Cout_g)              # scale folded -> epilogue is add+relu
    wmat = jnp.pad(wmat, ((0, 0), (0, 0), (0, Cout_pad - Cout_g))).astype(compute_dtype)
    shift_g = jnp.pad(eff_shift.reshape(G, 1, Cout_g),
                      ((0, 0), (0, 0), (0, Cout_pad - Cout_g))).astype(jnp.float32)

    n_m_tiles = M_pad // TM
    itemsize_c = jnp.dtype(compute_dtype).itemsize
    cost = pl.CostEstimate(
        flops=2 * G * M_pad * Kc * Cout_pad,
        transcendentals=0,
        bytes_accessed=(G * M_pad * Kc * itemsize_c
                        + G * Kc * Cout_pad * itemsize_c
                        + G * Cout_pad * 4
                        + G * M_pad * Cout_pad * jnp.dtype(x.dtype).itemsize),
    )

    # NOTE: Kc is small here so no K-reduction grid axis is needed; for very
    # large Cin_g*K*K a third ("arbitrary") k axis + f32 VMEM accumulator would
    # keep tiles bounded.
    out = pl.pallas_call(
        _conv_bn_relu_kernel,
        out_shape=jax.ShapeDtypeStruct((G, M_pad, Cout_pad), x.dtype),
        grid_spec=pltpu.PrefetchScalarGridSpec(
            num_scalar_prefetch=0,
            grid=(G, n_m_tiles),
            in_specs=[
                pl.BlockSpec((None, TM, Kc), lambda g, m: (g, m, 0)),
                pl.BlockSpec((None, Kc, Cout_pad), lambda g, m: (g, 0, 0)),
                pl.BlockSpec((None, 1, Cout_pad), lambda g, m: (g, 0, 0)),
            ],
            out_specs=pl.BlockSpec((None, TM, Cout_pad), lambda g, m: (g, m, 0)),
        ),
        compiler_params=pltpu.CompilerParams(
            dimension_semantics=("parallel", "parallel"),
            vmem_limit_bytes=32 * 1024 * 1024,
        ),
        cost_estimate=cost,
    )(p, wmat, shift_g)

    # (G, M_pad, Cout_pad) -> (N, Cout, Ho, Wo)  (PyTorch grouped-conv channel order)
    out = out[:, :M, :Cout_g]
    out = out.reshape(G, N, Ho, Wo, Cout_g)
    out = out.transpose(1, 0, 4, 2, 3).reshape(N, Cout, Ho, Wo)
    return out


if __name__ == "__main__":
    key = jax.random.PRNGKey(0)
    N, Cin, Cout, K, HW = 2, 8, 8, 3, 16
    k1, k2, k3, k4, k5, k6, k7 = jax.random.split(key, 7)

    x            = jax.random.normal(k1, (N, Cin, HW, HW), jnp.float32)
    weight       = jax.random.normal(k2, (Cout, Cin // GROUPS, K, K), jnp.float32) * 0.1
    bias         = jax.random.normal(k3, (Cout,), jnp.float32) * 0.1
    gamma        = 1.0 + 0.1 * jax.random.normal(k4, (Cout,), jnp.float32)
    beta         = 0.1 * jax.random.normal(k5, (Cout,), jnp.float32)
    running_mean = 0.1 * jax.random.normal(k6, (Cout,), jnp.float32)
    running_var  = jnp.abs(jax.random.normal(k7, (Cout,), jnp.float32)) + 0.5

    y = conv2d_light_forward(x, weight, bias, gamma, beta,
                             running_mean, running_var,
                             stride=1, same_padding=False)
    y = jax.block_until_ready(y)

    # reference: XLA grouped conv + eval-mode BN + ReLU (f32)
    ref = jax.lax.conv_general_dilated(
        x, weight, window_strides=(1, 1), padding="VALID",
        dimension_numbers=("NCHW", "OIHW", "NCHW"), feature_group_count=GROUPS)
    ref = ref + bias[None, :, None, None]
    ref = (ref - running_mean[None, :, None, None]) / jnp.sqrt(
        running_var[None, :, None, None] + 1e-5) * gamma[None, :, None, None] \
        + beta[None, :, None, None]
    ref = jnp.maximum(ref, 0.0)

    assert y.shape == (N, Cout, HW - K + 1, HW - K + 1), y.shape
    assert jnp.allclose(y, ref, atol=2e-2, rtol=2e-2), \
        float(jnp.max(jnp.abs(y - ref)))
    print("KERNEL_OK")
</pallas_src>

<mosaic_0001>
module attributes {stable_mosaic.version = 11 : i64} {
  func.func @_conv_bn_relu_kernel(%arg0: i32, %arg1: i32, %arg2: memref<1x400x18xbf16, #tpu.memory_space<vmem>>, %arg3: memref<1x18x128xbf16, #tpu.memory_space<vmem>>, %arg4: memref<1x1x128xf32, #tpu.memory_space<vmem>>, %arg5: memref<1x400x128xf32, #tpu.memory_space<vmem>>) attributes {dimension_semantics = [#tpu.dimension_semantics<parallel>, #tpu.dimension_semantics<parallel>], iteration_bounds = array<i64: 4, 1>, scalar_prefetch = 0 : i64, scratch_operands = 0 : i64, tpu.core_type = #tpu.core_type<tc>, window_params = [{transform_indices = @transform_0, window_bounds = array<i64: 1, 400, 18>}, {transform_indices = @transform_1, window_bounds = array<i64: 1, 18, 128>}, {transform_indices = @transform_2, window_bounds = array<i64: 1, 1, 128>}, {transform_indices = @transform_3, window_bounds = array<i64: 1, 400, 128>}]} {
    %c0 = arith.constant 0 : index
    %c0_0 = arith.constant 0 : index
    %c0_1 = arith.constant 0 : index
    %0 = vector.load %arg2[%c0, %c0_0, %c0_1] : memref<1x400x18xbf16, #tpu.memory_space<vmem>>, vector<1x400x18xbf16>
    %1 = vector.shape_cast %0 : vector<1x400x18xbf16> to vector<400x18xbf16>
    %c0_2 = arith.constant 0 : index
    %c0_3 = arith.constant 0 : index
    %c0_4 = arith.constant 0 : index
    %2 = vector.load %arg3[%c0_2, %c0_3, %c0_4] : memref<1x18x128xbf16, #tpu.memory_space<vmem>>, vector<1x18x128xbf16>
    %3 = vector.shape_cast %2 : vector<1x18x128xbf16> to vector<18x128xbf16>
    %cst = arith.constant dense<0.000000e+00> : vector<400x128xf32>
    %4 = tpu.matmul %1, %3, %cst {dimension_numbers = #tpu.dot_dimension_numbers<[1], [0], [0], [1], [0, 0, 1, 1], [], []>} : vector<400x18xbf16>, vector<18x128xbf16>, vector<400x128xf32> -> vector<400x128xf32>
    %c0_5 = arith.constant 0 : index
    %c0_6 = arith.constant 0 : index
    %c0_7 = arith.constant 0 : index
    %5 = vector.load %arg4[%c0_5, %c0_6, %c0_7] : memref<1x1x128xf32, #tpu.memory_space<vmem>>, vector<1x1x128xf32>
    %6 = vector.shape_cast %5 : vector<1x1x128xf32> to vector<1x128xf32>
    %7 = vector.broadcast %6 : vector<1x128xf32> to vector<400x128xf32>
    %8 = arith.addf %4, %7 : vector<400x128xf32>
    %cst_8 = arith.constant 0.000000e+00 : f32
    %9 = vector.broadcast %cst_8 : f32 to vector<400x128xf32>
    %10 = arith.maximumf %8, %9 : vector<400x128xf32>
    %c0_9 = arith.constant 0 : index
    %c0_10 = arith.constant 0 : index
    %c0_11 = arith.constant 0 : index
    %11 = vector.load %arg5[%c0_9, %c0_10, %c0_11] : memref<1x400x128xf32, #tpu.memory_space<vmem>>, vector<1x400x128xf32>
    %12 = vector.shape_cast %11 : vector<1x400x128xf32> to vector<400x128xf32>
    %13 = vector.shape_cast %10 : vector<400x128xf32> to vector<1x400x128xf32>
    tpu.vector_store %arg5[%c0_9, %c0_10, %c0_11], %13 {strides = array<i32>} : memref<1x400x128xf32, #tpu.memory_space<vmem>>, vector<1x400x128xf32>,
    return
  }
  func.func @transform_0(%arg0: i32, %arg1: i32) -> (i32, i32, i32) {
    %c0_i32 = arith.constant 0 : i32
    %c0_i32_0 = arith.constant 0 : i32
    return %arg0, %arg1, %c0_i32 : i32, i32, i32
  }
  func.func @transform_1(%arg0: i32, %arg1: i32) -> (i32, i32, i32) {
    %c0_i32 = arith.constant 0 : i32
    %c0_i32_0 = arith.constant 0 : i32
    %c0_i32_1 = arith.constant 0 : i32
    return %arg0, %c0_i32, %c0_i32_0 : i32, i32, i32
  }
  func.func @transform_2(%arg0: i32, %arg1: i32) -> (i32, i32, i32) {
    %c0_i32 = arith.constant 0 : i32
    %c0_i32_0 = arith.constant 0 : i32
    %c0_i32_1 = arith.constant 0 : i32
    return %arg0, %c0_i32, %c0_i32_0 : i32, i32, i32
  }
  func.func @transform_3(%arg0: i32, %arg1: i32) -> (i32, i32, i32) {
    %c0_i32 = arith.constant 0 : i32
    %c0_i32_0 = arith.constant 0 : i32
    return %arg0, %arg1, %c0_i32 : i32, i32, i32
  }
}

</mosaic_0001>

<bundles_post_ra>
// kernel: tpu_custom_call.1
= control target key start
LH: loop header
LB: loop body
LE: loop exit
PB: predicated region body
PF: predicated region fallthrough
CT: control target
= control target key end

     0   :  { %8 = vsyncpa [#allocation3], 0  ;;  %s1467_s0 = inlined_call_operand.vmem [shape: bf16[4,400,18], index: 0, kind: input, shape index: {}]   ;;  %s1468_s1 = inlined_call_operand.vmem [shape: bf16[4,18,128], index: 1, kind: input, shape index: {}]   ;;  %s1469_s2 = inlined_call_operand.vmem [shape: f32[4,1,128], index: 2, kind: input, shape index: {}]   ;;  %s1470_s3 = inlined_call_operand.hbm [shape: f32[4,400,128], index: 3, kind: output, shape index: {}]  }
   0x1   :  { %10 = vsyncpa [#allocation3 + $0x1], 0  ;;  %s1193_s12 = smov 0   ;;  %s1195_s13 = smov 0  }
   0x2   :  { %s1197_s14 = smov 0   ;;  %s1199_s15 = smov 0  }
   0x3   :  { %s1201_s16 = smov 0   ;;  %s1203_s17 = smov 0  }
   0x4 LB: > { %s858_s18 = sadd.s32 4294967295, %s1169_s17   ;;  %s859_s19 = sadd.s32 4294967294, %s1169_s17   ;;  %s1169_s17 = sphi %s1203_s17, %s16_s17   ;;  %s1165_s16 = sphi %s1201_s16, %s1477_s16   ;;  %s1161_s15 = sphi %s1199_s15, %s1476_s15   ;;  %s1157_s14 = sphi %s1197_s14, %s1475_s14   ;;  %s1153_s13 = sphi %s1195_s13, %s1474_s13   ;;  %s1149_s12 = sphi %s1193_s12, %s1473_s12  }
   0x5   : > { %s28_s20 = sadd.s32 1, %s1165_s16  ;;  %s117_s21 = sadd.s32 1, %s1157_s14 }
   0x6   : > { %p30_p0 = scmp.ge.s32.totalorder %s28_s20, 4  ;;  %p127_p1 = scmp.ne.s32.totalorder %s1157_s14, %s1153_s13 }
   0x7   : > { %p128_p2 = scmp.eq.s32.totalorder %s858_s18, 3  ;;  %p133_p3 = scmp.ne.s32.totalorder %s1153_s13, %s1149_s12 }
   0x8   : > { %s1479_s20 = smov (%p30_p0, %s28_s20), 0  ;;  %p134_p5 = scmp.eq.s32.totalorder %s859_s19, 3 }
   0x9   : > { %p1233_p4 = por %p128_p2, %p127_p1  ;;  %s112_s23 = ssub.s32 %s1165_s16, %s1479_s20 }
   0xa   : > { %p862_p6 = scmp.ge.s32.totalorder %s1169_s17, 1  ;;  %p115_p7 = scmp.eq.s32.totalorder %s112_s23, 0 }
   0xb   : > { %p1240_p8 = por %p134_p5, %p133_p3  ;;  %p179_p9 = scmp.lt.s32.totalorder %s1169_s17, 5 }
   0xc   : > { %s1246_s25 = scalar_select %p115_p7, %s1157_s14, %s117_s21  }
   0xd   : > { %p180_p10 = pnand %p862_p6, %p179_p9 }
   0xe   : > { %p216_p11 = scmp.lt.s32.totalorder (!%p180_p10), %s1161_s15, 3  ;;  %s212_s11 = sand.u32 (!%p180_p10), 1, %s1153_s13  }
   0xf   : > { %183 = sbr.rel (%p180_p10) target bundleno = 282 (0x11a), region = 32  ;;  %s1111_s9 = scalar_lea.hbm (!%p180_p10), %s1470_s3, 1600 }
  0x10   : > { %s1029_s21 = smul.u32 (!%p180_p10), 400, %s212_s11 }
  0x12   : > { %s1328_s23 = scalar_lea.vmem (!%p180_p10), [#allocation2], %s1029_s21 }
  0x14   : > { %s1250_s26 = scalar_select %p216_p11, %s1161_s15, 3  ;;  %vm502_vm0 = vcmask 1040384   ;;  %vm426_vm1 = vcmask 146432  }
  0x16   : > { %s232_s29 = scalar_lea.vmem %s1469_s2, %s1250_s26  ;;  %s1031_s30 = smul.u32 12, %s1250_s26 }
  0x17   : > { %s1030_s7 = smul.u32 200, %s1250_s26  ;;  %v1322_v30 = vld [vmem:[%s232_s29] ss:$0 sm:$0xff] }
  0x18   : > { %s229_s6 = scalar_lea.vmem %s1468_s1, %s1031_s30  ;;  %s1032_s26 = smul.u32 400, %s1161_s15 }
  0x19   : > { %v287_v0 = vld [vmem:[%s229_s6 + $0x8] sm:$0x1]  ;;  %s1264_s10 = scalar_lea.vmem %s1467_s0, %s1030_s7  ;;  %v1022_v4 = vld [vmem:[%s229_s6] sm:$0xff]  ;;  %s755_s30 = sshll.u32 %s1328_s23, 4  ;;  %s756_s30 = int_to_ptr.vmem [resolvable:$true] %s755_s30 }
  0x1a   : > { %v422_v1 = vunpack.c.l.b16 %v287_v0  ;;  %v1003_v5 = vld [vmem:[%s1264_s10 + $0x30] sm:$0xff]  ;;  %v1010_v6 = vld [vmem:[%s1264_s10 + $0x68] sm:$0xff]  ;;  %v997_v7 = vld [vmem:[%s1264_s10] sm:$0xff]  ;;  %s754_s29 = scalar_lea.hbm %s1470_s3, %s1032_s26  ;;  %s741_s15 = scalar_lea.sflag [#allocation3], %s212_s11 }
  0x1b   : > { %v1017_v8 = vld [vmem:[%s1264_s10 + $0xa0] sm:$0xff]  ;;  %v1004_v9 = vld [vmem:[%s1264_s10 + $0x38] sm:$0xff]  ;;  %v1011_v10 = vld [vmem:[%s1264_s10 + $0x70] sm:$0xff]  ;;  %s757_s4 = sshll.u32 %s754_s29, 4  ;;  %s758_s4 = int_to_ptr.hbm [resolvable:$true] %s757_s4 }
  0x1c   : > { %v424_v2 = vpack.c.b16 %v422_v1, %v422_v1  ;;  %v998_v11 = vld [vmem:[%s1264_s10 + $0x8] sm:$0xff]  ;;  %v1005_v13 = vld [vmem:[%s1264_s10 + $0x40] sm:$0xff]  ;;  %v1012_v14 = vld [vmem:[%s1264_s10 + $0x78] sm:$0xff]  ;;  %s1105_s5 = sshra.s32 %s758_s4, 4  ;;  %s1106_s5 = int_to_ptr.hbm [resolvable:$true] %s1105_s5 }
  0x1d   : > { %v1018_v12 = vld [vmem:[%s1264_s10 + $0xa8] sm:$0xff]  ;;  %v999_v15 = vld [vmem:[%s1264_s10 + $0x10] sm:$0xff]  ;;  %v1013_v18 = vld [vmem:[%s1264_s10 + $0x80] sm:$0xff]  ;;  %s1107_s6 = scalar_lea.hbm %s1106_s5, 400  ;;  %p1112_p1 = scmp.lt.s32.totalorder %s1106_s5, %s1470_s3 }
  0x1e   : > { %v504_v3 = vsel %vm502_vm0, %v424_v2, 0  ;;  %v1019_v16 = vld [vmem:[%s1264_s10 + $0xb0] sm:$0xff]  ;;  %v1006_v17 = vld [vmem:[%s1264_s10 + $0x48] sm:$0xff]  ;;  %v1000_v19 = vld [vmem:[%s1264_s10 + $0x18] sm:$0xff]  ;;  %p1108_p12 = scmp.ne.s32.totalorder %s1106_s5, %s1107_s6  ;;  %p1113_p2 = scmp.lt.s32.totalorder %s1111_s9, %s1107_s6 }
  0x1f   : > { %1023 = vmatpush.bf16.msra.mxu1 %v504_v3  ;;  %1024 = vmatpush.bf16.msra.mxu2 %v504_v3  ;;  %v1020_v20 = vld [vmem:[%s1264_s10 + $0xb8] sm:$0xff]  ;;  %v1007_v21 = vld [vmem:[%s1264_s10 + $0x50] sm:$0xff]  ;;  %v1014_v22 = vld [vmem:[%s1264_s10 + $0x88] sm:$0xff] }
  0x20   : > { %512 = vmatpush.bf16.msra.mxu0 %v504_v3  ;;  %1025 = vmatpush.bf16.msra.mxu3 %v504_v3  ;;  %v1001_v23 = vld [vmem:[%s1264_s10 + $0x20] sm:$0xff]  ;;  %v1008_v25 = vld [vmem:[%s1264_s10 + $0x58] sm:$0xff]  ;;  %v1015_v26 = vld [vmem:[%s1264_s10 + $0x90] sm:$0xff]  ;;  %p1109_p13 = pnand %p1108_p12, %p1233_p4  ;;  %p1114_p3 = por %p1113_p2, %p1112_p1 }
  0x21   : > { %v1021_v24 = vld [vmem:[%s1264_s10 + $0xc0] sm:$0xff]  ;;  %v1002_v27 = vld [vmem:[%s1264_s10 + $0x28] sm:$0xff]  ;;  %v1016_v29 = vld [vmem:[%s1264_s10 + $0x98] sm:$0xff] }
  0x22   : > { %v1009_v28 = vld [vmem:[%s1264_s10 + $0x60] sm:$0xff]  ;;  %p1110_p0 = pneg %p1109_p13 }
  0x23   : > { %1026 = vmatpush.bf16.msra.mxu1 %v1022_v4  ;;  %1027 = vmatpush.bf16.msra.mxu2 %v1022_v4 }
  0x24   : > { %513 = vmatpush.bf16.msra.mxu0 %v1022_v4  ;;  %1028 = vmatpush.bf16.msra.mxu3 %v1022_v4  ;;  %p1115_p5 = pnand %p1114_p3, %p1110_p0 }
  0x26   : > { %975 = vmatmul.msk.bf16.vlgmr.msra.gmra.mxu1 %vm426_vm1, %v1003_v5  ;;  %982 = vmatmul.msk.bf16.vlgmr.msra.gmra.mxu2 %vm426_vm1, %v1010_v6 }
  0x27   : > { %969 = vmatmul.msk.bf16.vlgmr.msra.gmra.mxu0 %vm426_vm1, %v997_v7  ;;  %989 = vmatmul.msk.bf16.vlgmr.msra.gmra.mxu3 %vm426_vm1, %v1017_v8 }
  0x36   : > { %976 = vmatmul.msk.bf16.gmra.mxu1 %vm426_vm1, %v1004_v9  ;;  %983 = vmatmul.msk.bf16.gmra.mxu2 %vm426_vm1, %v1011_v10 }
  0x37   : > { %970 = vmatmul.msk.bf16.gmra.mxu0 %vm426_vm1, %v998_v11  ;;  %990 = vmatmul.msk.bf16.gmra.mxu3 %vm426_vm1, %v1018_v12 }
  0x46   : > { %977 = vmatmul.msk.bf16.gmra.mxu1 %vm426_vm1, %v1005_v13  ;;  %984 = vmatmul.msk.bf16.gmra.mxu2 %vm426_vm1, %v1012_v14 }
  0x47   : > { %971 = vmatmul.msk.bf16.gmra.mxu0 %vm426_vm1, %v999_v15  ;;  %991 = vmatmul.msk.bf16.gmra.mxu3 %vm426_vm1, %v1019_v16 }
  0x56   : > { %978 = vmatmul.msk.bf16.gmra.mxu1 %vm426_vm1, %v1006_v17  ;;  %985 = vmatmul.msk.bf16.gmra.mxu2 %vm426_vm1, %v1013_v18 }
  0x57   : > { %972 = vmatmul.msk.bf16.gmra.mxu0 %vm426_vm1, %v1000_v19  ;;  %992 = vmatmul.msk.bf16.gmra.mxu3 %vm426_vm1, %v1020_v20 }
  0x66   : > { %979 = vmatmul.msk.bf16.gmra.mxu1 %vm426_vm1, %v1007_v21  ;;  %986 = vmatmul.msk.bf16.gmra.mxu2 %vm426_vm1, %v1014_v22 }
  0x67   : > { %973 = vmatmul.msk.bf16.gmra.mxu0 %vm426_vm1, %v1001_v23  ;;  %993 = vmatmul.msk.bf16.gmra.mxu3 %vm426_vm1, %v1021_v24 }
  0x76   : > { %980 = vmatmul.msk.bf16.gmra.mxu1 %vm426_vm1, %v1008_v25  ;;  %987 = vmatmul.msk.bf16.gmra.mxu2 %vm426_vm1, %v1015_v26 }
  0x77   : > { %974 = vmatmul.msk.bf16.gmra.mxu0 %vm426_vm1, %v1002_v27 }
  0x86   : > { %981 = vmatmul.msk.bf16.gmra.mxu1 %vm426_vm1, %v1009_v28  ;;  %988 = vmatmul.msk.bf16.gmra.mxu2 %vm426_vm1, %v1016_v29 }
  0xa3   : > { %v545_v31 = vpop.f32.mrf.mxu1 }
  0xa4   : > { %v546_v32 = vadd.f32 %v1322_v30, %v545_v31  ;;  %v515_v33 = vpop.f32.mrf.mxu0 }
  0xa5   : > { %v516_v34 = vadd.f32 %v1322_v30, %v515_v33 }
  0xa6   : > { %v652_v35 = vmax.f32 %v546_v32, 0.0 }
  0xa7   : > { %v640_v36 = vmax.f32 %v516_v34, 0.0 }
  0xa8   : > { %702 = vst [vmem:[%s1328_s23 + $0x60] sm:$0xff] %v652_v35 }
  0xa9   : > { %v580_v37 = vpop.f32.mrf.mxu2  ;;  %690 = vst [vmem:[%s1328_s23] sm:$0xff] %v640_v36 }
  0xaa   : > { %v581_v38 = vadd.f32 %v1322_v30, %v580_v37  ;;  %v615_v39 = vpop.f32.mrf.mxu3 }
  0xab   : > { %v547_v40 = vpop.f32.mrf.mxu1  ;;  %v616_v41 = vadd.f32 %v1322_v30, %v615_v39 }
  0xac   : > { %v666_v42 = vmax.f32 %v581_v38, 0.0  ;;  %v548_v43 = vadd.f32 %v1322_v30, %v547_v40  ;;  %v517_v44 = vpop.f32.mrf.mxu0 }
  0xad   : > { %v518_v45 = vadd.f32 %v1322_v30, %v517_v44  ;;  %v680_v46 = vmax.f32 %v616_v41, 0.0 }
  0xae   : > { %716 = vst [vmem:[%s1328_s23 + $0xd0] sm:$0xff] %v666_v42  ;;  %v653_v47 = vmax.f32 %v548_v43, 0.0 }
  0xaf   : > { %v641_v48 = vmax.f32 %v518_v45, 0.0  ;;  %730 = vst [vmem:[%s1328_s23 + $0x140] sm:$0xff] %v680_v46 }
  0xb0   : > { %703 = vst [vmem:[%s1328_s23 + $0x68] sm:$0xff] %v653_v47 }
  0xb1   : > { %v582_v49 = vpop.f32.mrf.mxu2  ;;  %691 = vst [vmem:[%s1328_s23 + $0x8] sm:$0xff] %v641_v48 }
  0xb2   : > { %v583_v50 = vadd.f32 %v1322_v30, %v582_v49  ;;  %v617_v51 = vpop.f32.mrf.mxu3 }
  0xb3   : > { %v550_v52 = vpop.f32.mrf.mxu1  ;;  %v618_v53 = vadd.f32 %v1322_v30, %v617_v51 }
  0xb4   : > { %v667_v54 = vmax.f32 %v583_v50, 0.0  ;;  %v551_v55 = vadd.f32 %v1322_v30, %v550_v52  ;;  %v520_v56 = vpop.f32.mrf.mxu0 }
  0xb5   : > { %v521_v57 = vadd.f32 %v1322_v30, %v520_v56  ;;  %v681_v58 = vmax.f32 %v618_v53, 0.0 }
  0xb6   : > { %717 = vst [vmem:[%s1328_s23 + $0xd8] sm:$0xff] %v667_v54  ;;  %v654_v59 = vmax.f32 %v551_v55, 0.0 }
  0xb7   : > { %v642_v60 = vmax.f32 %v521_v57, 0.0  ;;  %731 = vst [vmem:[%s1328_s23 + $0x148] sm:$0xff] %v681_v58 }
  0xb8   : > { %704 = vst [vmem:[%s1328_s23 + $0x70] sm:$0xff] %v654_v59 }
  0xb9   : > { %v585_v61 = vpop.f32.mrf.mxu2  ;;  %692 = vst [vmem:[%s1328_s23 + $0x10] sm:$0xff] %v642_v60 }
  0xba   : > { %v586_v62 = vadd.f32 %v1322_v30, %v585_v61  ;;  %v620_v63 = vpop.f32.mrf.mxu3 }
  0xbb   : > { %v552_v0 = vpop.f32.mrf.mxu1  ;;  %v621_v1 = vadd.f32 %v1322_v30, %v620_v63 }
  0xbc   : > { %v668_v2 = vmax.f32 %v586_v62, 0.0  ;;  %v553_v3 = vadd.f32 %v1322_v30, %v552_v0  ;;  %v522_v4 = vpop.f32.mrf.mxu0 }
  0xbd   : > { %v523_v5 = vadd.f32 %v1322_v30, %v522_v4  ;;  %v682_v6 = vmax.f32 %v621_v1, 0.0 }
  0xbe   : > { %718 = vst [vmem:[%s1328_s23 + $0xe0] sm:$0xff] %v668_v2  ;;  %v655_v7 = vmax.f32 %v553_v3, 0.0 }
  0xbf   : > { %v643_v8 = vmax.f32 %v523_v5, 0.0  ;;  %732 = vst [vmem:[%s1328_s23 + $0x150] sm:$0xff] %v682_v6 }
  0xc0   : > { %705 = vst [vmem:[%s1328_s23 + $0x78] sm:$0xff] %v655_v7 }
  0xc1   : > { %v587_v9 = vpop.f32.mrf.mxu2  ;;  %693 = vst [vmem:[%s1328_s23 + $0x18] sm:$0xff] %v643_v8 }
  0xc2   : > { %v588_v10 = vadd.f32 %v1322_v30, %v587_v9  ;;  %v622_v11 = vpop.f32.mrf.mxu3 }
  0xc3   : > { %v555_v12 = vpop.f32.mrf.mxu1  ;;  %v623_v13 = vadd.f32 %v1322_v30, %v622_v11 }
  0xc4   : > { %v669_v14 = vmax.f32 %v588_v10, 0.0  ;;  %v556_v15 = vadd.f32 %v1322_v30, %v555_v12  ;;  %v525_v16 = vpop.f32.mrf.mxu0 }
  0xc5   : > { %v526_v17 = vadd.f32 %v1322_v30, %v525_v16  ;;  %v683_v18 = vmax.f32 %v623_v13, 0.0 }
  0xc6   : > { %719 = vst [vmem:[%s1328_s23 + $0xe8] sm:$0xff] %v669_v14  ;;  %v656_v19 = vmax.f32 %v556_v15, 0.0 }
  0xc7   : > { %v644_v20 = vmax.f32 %v526_v17, 0.0  ;;  %733 = vst [vmem:[%s1328_s23 + $0x158] sm:$0xff] %v683_v18 }
  0xc8   : > { %706 = vst [vmem:[%s1328_s23 + $0x80] sm:$0xff] %v656_v19 }
  0xc9   : > { %v590_v21 = vpop.f32.mrf.mxu2  ;;  %694 = vst [vmem:[%s1328_s23 + $0x20] sm:$0xff] %v644_v20 }
  0xca   : > { %v591_v22 = vadd.f32 %v1322_v30, %v590_v21  ;;  %v625_v23 = vpop.f32.mrf.mxu3 }
  0xcb   : > { %v557_v24 = vpop.f32.mrf.mxu1  ;;  %v626_v25 = vadd.f32 %v1322_v30, %v625_v23 }
  0xcc   : > { %v670_v26 = vmax.f32 %v591_v22, 0.0  ;;  %v558_v27 = vadd.f32 %v1322_v30, %v557_v24  ;;  %v527_v28 = vpop.f32.mrf.mxu0 }
  0xcd   : > { %v528_v29 = vadd.f32 %v1322_v30, %v527_v28  ;;  %v684_v31 = vmax.f32 %v626_v25, 0.0 }
  0xce   : > { %720 = vst [vmem:[%s1328_s23 + $0xf0] sm:$0xff] %v670_v26  ;;  %v657_v32 = vmax.f32 %v558_v27, 0.0 }
  0xcf   : > { %v645_v33 = vmax.f32 %v528_v29, 0.0  ;;  %734 = vst [vmem:[%s1328_s23 + $0x160] sm:$0xff] %v684_v31 }
  0xd0   : > { %707 = vst [vmem:[%s1328_s23 + $0x88] sm:$0xff] %v657_v32 }
  0xd1   : > { %v592_v34 = vpop.f32.mrf.mxu2  ;;  %695 = vst [vmem:[%s1328_s23 + $0x28] sm:$0xff] %v645_v33 }
  0xd2   : > { %v593_v35 = vadd.f32 %v1322_v30, %v592_v34  ;;  %v627_v36 = vpop.f32.mrf.mxu3 }
  0xd3   : > { %v560_v37 = vpop.f32.mrf.mxu1  ;;  %v628_v38 = vadd.f32 %v1322_v30, %v627_v36 }
  0xd4   : > { %v671_v39 = vmax.f32 %v593_v35, 0.0  ;;  %v561_v40 = vadd.f32 %v1322_v30, %v560_v37  ;;  %v530_v41 = vpop.f32.mrf.mxu0 }
  0xd5   : > { %v531_v42 = vadd.f32 %v1322_v30, %v530_v41  ;;  %v685_v43 = vmax.f32 %v628_v38, 0.0 }
  0xd6   : > { %721 = vst [vmem:[%s1328_s23 + $0xf8] sm:$0xff] %v671_v39  ;;  %v658_v44 = vmax.f32 %v561_v40, 0.0 }
  0xd7   : > { %v646_v45 = vmax.f32 %v531_v42, 0.0  ;;  %735 = vst [vmem:[%s1328_s23 + $0x168] sm:$0xff] %v685_v43 }
  0xd8   : > { %708 = vst [vmem:[%s1328_s23 + $0x90] sm:$0xff] %v658_v44 }
  0xd9   : > { %v595_v46 = vpop.f32.mrf.mxu2  ;;  %696 = vst [vmem:[%s1328_s23 + $0x30] sm:$0xff] %v646_v45 }
  0xda   : > { %v596_v47 = vadd.f32 %v1322_v30, %v595_v46  ;;  %v630_v48 = vpop.f32.mrf.mxu3 }
  0xdb   : > { %v562_v49 = vpop.f32.mrf.mxu1  ;;  %v631_v50 = vadd.f32 %v1322_v30, %v630_v48 }
  0xdc   : > { %v672_v51 = vmax.f32 %v596_v47, 0.0  ;;  %v563_v52 = vadd.f32 %v1322_v30, %v562_v49  ;;  %v532_v53 = vpop.f32.mrf.mxu0 }
  0xdd   : > { %v533_v54 = vadd.f32 %v1322_v30, %v532_v53  ;;  %v686_v55 = vmax.f32 %v631_v50, 0.0 }
  0xde   : > { %722 = vst [vmem:[%s1328_s23 + $0x100] sm:$0xff] %v672_v51  ;;  %v659_v56 = vmax.f32 %v563_v52, 0.0 }
  0xdf   : > { %v647_v57 = vmax.f32 %v533_v54, 0.0  ;;  %736 = vst [vmem:[%s1328_s23 + $0x170] sm:$0xff] %v686_v55 }
  0xe0   : > { %709 = vst [vmem:[%s1328_s23 + $0x98] sm:$0xff] %v659_v56 }
  0xe1   : > { %v597_v58 = vpop.f32.mrf.mxu2  ;;  %697 = vst [vmem:[%s1328_s23 + $0x38] sm:$0xff] %v647_v57 }
  0xe2   : > { %v598_v59 = vadd.f32 %v1322_v30, %v597_v58  ;;  %v632_v60 = vpop.f32.mrf.mxu3 }
  0xe3   : > { %v565_v61 = vpop.f32.mrf.mxu1  ;;  %v633_v62 = vadd.f32 %v1322_v30, %v632_v60 }
  0xe4   : > { %v673_v63 = vmax.f32 %v598_v59, 0.0  ;;  %v566_v0 = vadd.f32 %v1322_v30, %v565_v61  ;;  %v535_v1 = vpop.f32.mrf.mxu0 }
  0xe5   : > { %v536_v2 = vadd.f32 %v1322_v30, %v535_v1  ;;  %v687_v3 = vmax.f32 %v633_v62, 0.0 }
  0xe6   : > { %723 = vst [vmem:[%s1328_s23 + $0x108] sm:$0xff] %v673_v63  ;;  %v660_v4 = vmax.f32 %v566_v0, 0.0 }
  0xe7   : > { %v648_v5 = vmax.f32 %v536_v2, 0.0  ;;  %737 = vst [vmem:[%s1328_s23 + $0x178] sm:$0xff] %v687_v3 }
  0xe8   : > { %710 = vst [vmem:[%s1328_s23 + $0xa0] sm:$0xff] %v660_v4 }
  0xe9   : > { %v600_v6 = vpop.f32.mrf.mxu2  ;;  %698 = vst [vmem:[%s1328_s23 + $0x40] sm:$0xff] %v648_v5 }
  0xea   : > { %v601_v7 = vadd.f32 %v1322_v30, %v600_v6  ;;  %v635_v8 = vpop.f32.mrf.mxu3 }
  0xeb   : > { %v567_v9 = vpop.f32.mrf.mxu1  ;;  %v636_v10 = vadd.f32 %v1322_v30, %v635_v8 }
  0xec   : > { %v674_v11 = vmax.f32 %v601_v7, 0.0  ;;  %v568_v12 = vadd.f32 %v1322_v30, %v567_v9  ;;  %v537_v13 = vpop.f32.mrf.mxu0 }
  0xed   : > { %v538_v14 = vadd.f32 %v1322_v30, %v537_v13  ;;  %v688_v15 = vmax.f32 %v636_v10, 0.0 }
  0xee   : > { %724 = vst [vmem:[%s1328_s23 + $0x110] sm:$0xff] %v674_v11  ;;  %v661_v16 = vmax.f32 %v568_v12, 0.0 }
  0xef   : > { %v649_v17 = vmax.f32 %v538_v14, 0.0  ;;  %738 = vst [vmem:[%s1328_s23 + $0x180] sm:$0xff] %v688_v15 }
  0xf0   : > { %711 = vst [vmem:[%s1328_s23 + $0xa8] sm:$0xff] %v661_v16 }
  0xf1   : > { %v602_v18 = vpop.f32.mrf.mxu2  ;;  %699 = vst [vmem:[%s1328_s23 + $0x48] sm:$0xff] %v649_v17 }
  0xf2   : > { %v603_v19 = vadd.f32 %v1322_v30, %v602_v18  ;;  %v637_v20 = vpop.f32.mrf.mxu3 }
  0xf3   : > { %v570_v21 = vpop.f32.mrf.mxu1  ;;  %v638_v22 = vadd.f32 %v1322_v30, %v637_v20 }
  0xf4   : > { %v675_v23 = vmax.f32 %v603_v19, 0.0  ;;  %v571_v24 = vadd.f32 %v1322_v30, %v570_v21  ;;  %v540_v25 = vpop.f32.mrf.mxu0 }
  0xf5   : > { %v541_v26 = vadd.f32 %v1322_v30, %v540_v25  ;;  %v689_v27 = vmax.f32 %v638_v22, 0.0 }
  0xf6   : > { %725 = vst [vmem:[%s1328_s23 + $0x118] sm:$0xff] %v675_v23  ;;  %v662_v28 = vmax.f32 %v571_v24, 0.0 }
  0xf7   : > { %v650_v29 = vmax.f32 %v541_v26, 0.0  ;;  %739 = vst [vmem:[%s1328_s23 + $0x188] sm:$0xff] %v689_v27 }
  0xf8   : > { %712 = vst [vmem:[%s1328_s23 + $0xb0] sm:$0xff] %v662_v28 }
  0xf9   : > { %v605_v31 = vpop.f32.mrf.mxu2  ;;  %700 = vst [vmem:[%s1328_s23 + $0x50] sm:$0xff] %v650_v29 }
  0xfa   : > { %v606_v32 = vadd.f32 %v1322_v30, %v605_v31 }
  0xfb   : > { %v572_v33 = vpop.f32.mrf.mxu1 }
  0xfc   : > { %v676_v34 = vmax.f32 %v606_v32, 0.0  ;;  %v573_v35 = vadd.f32 %v1322_v30, %v572_v33  ;;  %v542_v36 = vpop.f32.mrf.mxu0 }
  0xfd   : > { %v543_v37 = vadd.f32 %v1322_v30, %v542_v36 }
  0xfe   : > { %726 = vst [vmem:[%s1328_s23 + $0x120] sm:$0xff] %v676_v34  ;;  %v663_v38 = vmax.f32 %v573_v35, 0.0 }
  0xff   : > { %v651_v39 = vmax.f32 %v543_v37, 0.0 }
 0x100   : > { %713 = vst [vmem:[%s1328_s23 + $0xb8] sm:$0xff] %v663_v38 }
 0x101   : > { %v607_v40 = vpop.f32.mrf.mxu2  ;;  %701 = vst [vmem:[%s1328_s23 + $0x58] sm:$0xff] %v651_v39 }
 0x102   : > { %v608_v41 = vadd.f32 %v1322_v30, %v607_v40 }
 0x103   : > { %v575_v42 = vpop.f32.mrf.mxu1 }
 0x104   : > { %v677_v43 = vmax.f32 %v608_v41, 0.0  ;;  %v576_v44 = vadd.f32 %v1322_v30, %v575_v42 }
 0x106   : > { %727 = vst [vmem:[%s1328_s23 + $0x128] sm:$0xff] %v677_v43  ;;  %v664_v45 = vmax.f32 %v576_v44, 0.0 }
 0x108   : > { %714 = vst [vmem:[%s1328_s23 + $0xc0] sm:$0xff] %v664_v45 }
 0x109   : > { %v610_v46 = vpop.f32.mrf.mxu2 }
 0x10a   : > { %v611_v47 = vadd.f32 %v1322_v30, %v610_v46 }
 0x10b   : > { %v577_v48 = vpop.f32.mrf.mxu1 }
 0x10c   : > { %v678_v49 = vmax.f32 %v611_v47, 0.0  ;;  %v578_v50 = vadd.f32 %v1322_v30, %v577_v48 }
 0x10e   : > { %728 = vst [vmem:[%s1328_s23 + $0x130] sm:$0xff] %v678_v49  ;;  %v665_v51 = vmax.f32 %v578_v50, 0.0 }
 0x110   : > { %715 = vst [vmem:[%s1328_s23 + $0xc8] sm:$0xff] %v665_v51 }
 0x111   : > { %v612_v52 = vpop.f32.mrf.mxu2 }
 0x112   : > { %v613_v53 = vadd.f32 %v1322_v30, %v612_v52 }
 0x114   : > { %v679_v54 = vmax.f32 %v613_v53, 0.0 }
 0x116   : > { %729 = vst [vmem:[%s1328_s23 + $0x138] sm:$0xff] %v679_v54 }
 0x117   : > { %1118 = shalt.err (!%p1115_p5)
}
 0x118   : > { %s1171_s11 = smov 128   ;;  %s1172_s19 = smov 8  }
 0x119   : > { %1033 = dma.vmem_to_hbm [thread:$0]  (%p1233_p4), %s756_s30, 6400, %s758_s4, %s741_s15, %s1171_s11, %s1171_s11, %s1172_s19  }
 0x11a PF: > { %p1039_p6 = scmp.ge.s32.totalorder %s1169_s17, 2  ;;  %s772_s21 = sand.u32 1, %s1149_s12  }
 0x11b   : > { %s773_s23 = scalar_lea.sflag [#allocation3], %s772_s21 }
 0x11c   : > { %p1036_p7 = pnand %p1039_p6, %p1240_p8 }
 0x11e   : > { %p1037_p9 = pneg %p1036_p7 }
 0x120   : > { %1144 = dma.done.wait (%p1037_p9), %s773_s23, 6400  }
 0x121   : > { %1146 = vsyncadd (%p1037_p9), %s773_s23, 4294960896  ;;  %s16_s17 = sadd.s32 1, %s1169_s17   ;;  %s1473_s12 = smov %s1153_s13 }
 0x122   : > { %p13_p10 = scmp.ge.s32.totalorder %s16_s17, 6   ;;  %s1474_s13 = smov %s1157_s14 }
 0x123   : > { %s1475_s14 = smov %s1246_s25  ;;  %s1476_s15 = smov %s1165_s16 }
 0x124   : > { %s1477_s16 = smov %s1479_s20  ;;  %15 = sbr.rel (!%p13_p10) target bundleno = 4 (0x4), region = 73 }
 0x129   :  { %779 = vsyncpa [#allocation3], 1 }
 0x12a   :  { %781 = vsyncpa [#allocation3 + $0x1], 1 }

</bundles_post_ra>
